<compile_context>
chip_gen: v6e
topology: v6e:2x2x1
jax: 0.10.0
libtpu: 0.0.40
codegen_flags: <defaults>
</compile_context>

<pallas_src>
import jax
import jax.numpy as jnp
from jax.experimental import pallas as pl
from jax.experimental.pallas import tpu as pltpu

LANES = 1024      # wide, lane-dense slab -> long contiguous DMA bursts,
                  # unmasked wide vector stores, few grid steps
TILE_ROWS = 256   # 256 x 1024 x 4 B = 1 MiB f32 per tile
                  # ~6 MiB total with 3 refs double-buffered (v7x-safe)


def _pow_kernel_tensor_q(p_ref, x_ref, q_ref, o_ref):
    # p_ref: (1,) powParam in SMEM; x/q/o: (tile_rows, LANES) tiles in VMEM.
    # Memory-bound op: the p* multiply is free VPU filler under the HBM bound.
    o_ref[...] = p_ref[0] * jnp.power(x_ref[...], q_ref[...])


def _pow_kernel_scalar_q(s_ref, x_ref, o_ref):
    # s_ref: (2,) SMEM scalars [powParam, q]; x/o: (tile_rows, LANES) VMEM tiles
    o_ref[...] = s_ref[0] * jnp.power(x_ref[...], s_ref[1])


def _as_slab(flat, pad, pad_value):
    if pad:
        flat = jnp.pad(flat, (0, pad), constant_values=pad_value)
    return flat.reshape(-1, LANES)


def pow_model_forward(pow_param, x, q):
    """out = pow_param * x ** q, elementwise (q broadcast against x)."""
    orig_shape = x.shape
    dtype = x.dtype
    n_elem = x.size

    q = jnp.asarray(q, dtype)
    scalar_q = (q.size == 1)

    # Lane-dense 2-D slab; no padding pass in the common aligned NCHW case.
    pad = (-n_elem) % LANES
    x2d = _as_slab(x.reshape(-1), pad, 0.0)
    rows = x2d.shape[0]

    # Tile rows: big enough to amortize the ~0.35 us per-step overhead, small
    # enough to stay far inside every generation's VMEM budget. A partial last
    # block (rows % tile_rows != 0) is handled by Pallas edge masking.
    tile_rows = TILE_ROWS if rows >= TILE_ROWS else rows
    grid = (pl.cdiv(rows, tile_rows),)
    blk = pl.BlockSpec((tile_rows, LANES), lambda i: (i, 0))
    cparams = pltpu.CompilerParams(dimension_semantics=("parallel",))

    if scalar_q:
        # Do not materialize q to x's shape — pass it as an SMEM scalar.
        scalars = jnp.stack(
            [jnp.asarray(pow_param, dtype).reshape(()), q.reshape(())]
        ).astype(dtype)
        out2d = pl.pallas_call(
            _pow_kernel_scalar_q,
            out_shape=jax.ShapeDtypeStruct((rows, LANES), dtype),
            grid_spec=pltpu.PrefetchScalarGridSpec(
                num_scalar_prefetch=0,
                grid=grid,
                in_specs=[pl.BlockSpec(memory_space=pltpu.SMEM),  # [p, q]
                          blk],                                   # x slab
                out_specs=blk),
            compiler_params=cparams,
        )(scalars, x2d)
    else:
        # TODO(synk): a small-but-nonscalar broadcastable q (e.g. per-channel)
        # could be kept small and broadcast in-kernel; it is materialized here.
        if q.shape != orig_shape:
            q = jnp.broadcast_to(q, orig_shape)
        q2d = _as_slab(q.reshape(-1), pad, 1.0)   # tail: 0 ** 1 = 0, no NaNs
        p_arr = jnp.asarray(pow_param, dtype).reshape((1,))
        out2d = pl.pallas_call(
            _pow_kernel_tensor_q,
            out_shape=jax.ShapeDtypeStruct((rows, LANES), dtype),
            grid_spec=pltpu.PrefetchScalarGridSpec(
                num_scalar_prefetch=0,
                grid=grid,
                in_specs=[pl.BlockSpec(memory_space=pltpu.SMEM),  # powParam
                          blk,                                    # x slab
                          blk],                                   # q slab
                out_specs=blk),
            compiler_params=cparams,
        )(p_arr, x2d, q2d)

    if pad:
        return out2d.reshape(-1)[:n_elem].reshape(orig_shape)
    return out2d.reshape(orig_shape)


if __name__ == "__main__":
    key = jax.random.PRNGKey(0)
    kx, kq = jax.random.split(key)

    # Small NCHW input, consistent with an image-like tensor.
    x = jax.random.uniform(kx, (2, 4, 16, 16), dtype=jnp.float32,
                           minval=0.1, maxval=2.0)
    # Elementwise exponent tensor (same shape as x).
    q = jax.random.uniform(kq, (2, 4, 16, 16), dtype=jnp.float32,
                           minval=0.0, maxval=3.0)

    # Deterministic parameter init matching torch.tensor(1.0)
    pow_param = jnp.float32(1.0)

    # Tensor-q path
    out = jax.block_until_ready(pow_model_forward(pow_param, x, q))
    ref = pow_param * jnp.power(x, q)
    assert out.shape == x.shape and out.dtype == x.dtype
    assert jnp.allclose(out, ref, rtol=1e-5, atol=1e-5)

    # Scalar-q path (no full-size q materialization)
    out_s = jax.block_until_ready(
        pow_model_forward(pow_param, x, jnp.float32(2.0)))
    assert jnp.allclose(out_s, pow_param * jnp.power(x, 2.0),
                        rtol=1e-5, atol=1e-5)

    print("KERNEL_OK")
</pallas_src>

<mosaic_0001>
module attributes {stable_mosaic.version = 11 : i64} {
  func.func @_pow_kernel_tensor_q(%arg0: i32, %arg1: memref<1xf32, #tpu.memory_space<smem>>, %arg2: memref<2x1024xf32, #tpu.memory_space<vmem>>, %arg3: memref<2x1024xf32, #tpu.memory_space<vmem>>, %arg4: memref<2x1024xf32, #tpu.memory_space<vmem>>) attributes {dimension_semantics = [#tpu.dimension_semantics<parallel>], iteration_bounds = array<i64: 1>, scalar_prefetch = 0 : i64, scratch_operands = 0 : i64, tpu.core_type = #tpu.core_type<tc>, window_params = [{transform_indices = @transform_0, window_bounds = array<i64: 1>}, {transform_indices = @transform_1, window_bounds = array<i64: 2, 1024>}, {transform_indices = @transform_2, window_bounds = array<i64: 2, 1024>}, {transform_indices = @transform_3, window_bounds = array<i64: 2, 1024>}]} {
    %c0 = arith.constant 0 : index
    %0 = memref.load %arg1[%c0] : memref<1xf32, #tpu.memory_space<smem>>
    %c0_0 = arith.constant 0 : index
    %c0_1 = arith.constant 0 : index
    %1 = vector.load %arg2[%c0_0, %c0_1] : memref<2x1024xf32, #tpu.memory_space<vmem>>, vector<2x1024xf32>
    %c0_2 = arith.constant 0 : index
    %c0_3 = arith.constant 0 : index
    %2 = vector.load %arg3[%c0_2, %c0_3] : memref<2x1024xf32, #tpu.memory_space<vmem>>, vector<2x1024xf32>
    %3 = math.powf %1, %2 : vector<2x1024xf32>
    %4 = vector.broadcast %0 : f32 to vector<2x1024xf32>
    %5 = arith.mulf %4, %3 : vector<2x1024xf32>
    %c0_4 = arith.constant 0 : index
    %c0_5 = arith.constant 0 : index
    %6 = vector.load %arg4[%c0_4, %c0_5] : memref<2x1024xf32, #tpu.memory_space<vmem>>, vector<2x1024xf32>
    tpu.vector_store %arg4[%c0_4, %c0_5], %5 {strides = array<i32>} : memref<2x1024xf32, #tpu.memory_space<vmem>>, vector<2x1024xf32>,
    return
  }
  func.func @transform_0(%arg0: i32) -> i32 {
    %c0_i32 = arith.constant 0 : i32
    %c0_i32_0 = arith.constant 0 : i32
    return %c0_i32 : i32
  }
  func.func @transform_1(%arg0: i32) -> (i32, i32) {
    %c0_i32 = arith.constant 0 : i32
    %c0_i32_0 = arith.constant 0 : i32
    return %arg0, %c0_i32 : i32, i32
  }
  func.func @transform_2(%arg0: i32) -> (i32, i32) {
    %c0_i32 = arith.constant 0 : i32
    %c0_i32_0 = arith.constant 0 : i32
    return %arg0, %c0_i32 : i32, i32
  }
  func.func @transform_3(%arg0: i32) -> (i32, i32) {
    %c0_i32 = arith.constant 0 : i32
    %c0_i32_0 = arith.constant 0 : i32
    return %arg0, %c0_i32 : i32, i32
  }
}

</mosaic_0001>

<bundles_post_ra>
// kernel: tpu_custom_call.1
= control target key start
LH: loop header
LB: loop body
LE: loop exit
PB: predicated region body
PF: predicated region fallthrough
CT: control target
= control target key end

     0   :  { %9 = vsyncpa [#allocation4], 0  ;;  %s504_s0 = inlined_call_operand.<no memory space> [shape: f32[1], index: 0, kind: input, shape index: {}]   ;;  %s505_s1 = inlined_call_operand.hbm [shape: f32[2,1024], index: 1, kind: input, shape index: {}]   ;;  %s506_s2 = inlined_call_operand.hbm [shape: f32[2,1024], index: 2, kind: input, shape index: {}]   ;;  %s507_s3 = inlined_call_operand.hbm [shape: f32[2,1024], index: 3, kind: output, shape index: {}]  }
   0x1   :  { %10 = vsyncpa [#allocation7], 0 }
   0x2   :  { %11 = vsyncpa [#allocation5], 0  ;;  %s251_s12 = smov [#allocation3]   ;;  %s252_s14 = smov [#allocation6]  }
   0x3   :  { %s20_s13 = sshll.u32 %s251_s12, 4  ;;  %s30_s15 = sshll.u32 %s252_s14, 4  ;;  %s21_s13 = int_to_ptr.vmem [resolvable:$true] %s20_s13  ;;  %s31_s15 = int_to_ptr.vmem [resolvable:$true] %s30_s15 }
   0x4   :  { %s193_s16 = scalar_lea.vmem %s21_s13, 256  ;;  %p198_p1 = scmp.lt.s32.totalorder %s21_s13, %s21_s13 }
   0x5   :  { %p194_p0 = scmp.ne.s32.totalorder %s21_s13, %s193_s16  ;;  %p199_p2 = scmp.lt.s32.totalorder %s193_s16, %s193_s16 }
   0x7   :  { %p200_p3 = por %p199_p2, %p198_p1 }
   0x9   :  { %p201_p4 = pnand %p200_p3, %p194_p0 }
   0xb   :  { %204 = shalt.err (!%p201_p4)
}
   0xc   :  { %23 = dma.hbm_to_vmem [thread:$0]  %s505_s1, 256, %s21_s13, [#allocation4]  }
   0xd   :  { %s213_s19 = scalar_lea.vmem %s31_s15, 256  ;;  %p218_p6 = scmp.lt.s32.totalorder %s31_s15, %s31_s15 }
   0xe   :  { %p214_p5 = scmp.ne.s32.totalorder %s31_s15, %s213_s19  ;;  %p219_p7 = scmp.lt.s32.totalorder %s213_s19, %s213_s19 }
  0x10   :  { %p220_p8 = por %p219_p7, %p218_p6 }
  0x12   :  { %p221_p9 = pnand %p220_p8, %p214_p5 }
  0x14   :  { %224 = shalt.err (!%p221_p9)
}
  0x15   :  { %33 = dma.hbm_to_vmem [thread:$0]  %s506_s2, 256, %s31_s15, [#allocation7]  }
  0x16   :  { %245 = dma.done.wait [#allocation4], 256  }
  0x17   :  { %246 = vsyncadd [#allocation4], 4294967040 }
  0x18   :  { %247 = dma.done.wait [#allocation7], 256  }
  0x19   :  { %248 = vsyncadd [#allocation7], 4294967040  ;;  %v282_v0 = vld [vmem:[#allocation3] sm:$0xff]  ;;  %v288_v2 = vld [vmem:[#allocation3 + $0x8] sm:$0xff]  ;;  %v253_v25 = vmov 2139095040   ;;  %v254_v31 = vmov 0   ;;  %v47_v40 = vstv %s504_s0 }
  0x1a   :  { %v285_v1 = vand.u32 2147483647, %v282_v0  ;;  %v290_v3 = vld [vmem:[#allocation6] sm:$0xff]  ;;  %v296_v5 = vand.u32 2147483647, %v288_v2  ;;  %v299_v6 = vld [vmem:[#allocation6 + $0x8] sm:$0xff] }
  0x1b   :  { %v293_v4 = vand.u32 2147483647, %v290_v3  ;;  %v303_v8 = vand.u32 2147483647, %v299_v6  ;;  %v77_v9 = vtrunc.f32 %v290_v3  ;;  %v129_v13 = vtrunc.f32 %v299_v6  ;;  %s255_s0 = smov [#allocation8]  }
  0x1c   :  { %177 = vlog2.f32 %v285_v1  ;;  %vm512_vm2 = vcmp.lt.f32.partialorder %v290_v3, 0  ;;  %vm511_vm3 = vcmp.eq.f32.partialorder %v282_v0, 0  ;;  %vm510_vm5 = vcmp.lt.f32.partialorder %v282_v0, 0  ;;  %s58_s22 = sshll.u32 %s255_s0, 4  ;;  %s59_s22 = int_to_ptr.vmem [resolvable:$true] %s58_s22 }
  0x1d   :  { %179 = vlog2.f32 %v296_v5  ;;  %v81_v7 = vtrunc.f32 %v293_v4  ;;  %v133_v11 = vtrunc.f32 %v303_v8  ;;  %vm509_vm0 = vcmp.eq.f32.partialorder %v293_v4, 2139095040  ;;  %vm324_vm6 = vmand %vm512_vm2, %vm511_vm3  ;;  %s225_s23 = scalar_lea.vmem %s59_s22, 256  ;;  %p230_p11 = scmp.lt.s32.totalorder %s59_s22, %s59_s22 }
  0x1e   :  { %vm78_vm1 = vcmp.ne.f32.partialorder %v290_v3, %v77_v9  ;;  %vm508_vm7 = vcmp.eq.f32.partialorder %v303_v8, 2139095040  ;;  %vm130_vm8 = vcmp.ne.f32.partialorder %v299_v6, %v129_v13  ;;  %vm92_vm10 = vcmp.gt.f32.partialorder %v285_v1, 1065353216  ;;  %p226_p10 = scmp.ne.s32.totalorder %s59_s22, %s225_s23  ;;  %p231_p12 = scmp.lt.s32.totalorder %s225_s23, %s225_s23 }
  0x1f   :  { %v82_v10 = vcvt.f32.s32 %v81_v7  ;;  %vm315_vm4 = vmor %vm78_vm1, %vm509_vm0  ;;  %v134_v17 = vcvt.f32.s32 %v133_v11  ;;  %vm80_vm15 = vcmp.lt.f32.partialorder %v293_v4, 1266679808  ;;  %v108_v26 = vsel %vm512_vm2, 0, %v253_v25 }
  0x20   :  { %vm85_vm9 = vmneg %vm315_vm4  ;;  %vm513_vm0 = vcmp.eq.f32.partialorder %v288_v2, 0  ;;  %v109_v28 = vxor.u32 2147483648, %v108_v26  ;;  %p232_p13 = por %p231_p12, %p230_p11 }
  0x21   :  { %v83_v16 = vand.u32 1, %v82_v10  ;;  %vm337_vm12 = vmand %vm510_vm5, %vm315_vm4  ;;  %v135_v22 = vand.u32 1, %v134_v17 }
  0x22   :  { %vm344_vm13 = vmor %vm130_vm8, %vm508_vm7  ;;  %vm128_vm7 = vcmp.lt.f32.partialorder %v299_v6, 0  ;;  %p233_p0 = pnand %p232_p13, %p226_p10 }
  0x23   :  { %vm84_vm11 = vcmp.eq.s32.totalorder %v83_v16, 1  ;;  %vm350_vm14 = vmxor %vm512_vm2, %vm92_vm10  ;;  %vm136_vm4 = vcmp.eq.s32.totalorder %v135_v22, 1  ;;  %vm132_vm2 = vcmp.lt.f32.partialorder %v303_v8, 1266679808  ;;  %v160_v34 = vsel %vm128_vm7, 0, %v253_v25 }
  0x24   :  { %vm86_vm1 = vmand %vm84_vm11, %vm85_vm9  ;;  %vm144_vm9 = vcmp.gt.f32.partialorder %v296_v5, 1065353216  ;;  %vm91_vm11 = vcmp.lt.s32.totalorder %v282_v0, 0  ;;  %v161_v43 = vxor.u32 2147483648, %v160_v34  ;;  %v148_v48 = vsel %vm128_vm7, 2139095040, %v254_v31 }
  0x25   :  { %vm137_vm8 = vmneg %vm344_vm13 }
  0x26   :  { %vm365_vm5 = vmand %vm80_vm15, %vm86_vm1  ;;  %vm530_vm15 = vcmp.lt.f32.partialorder %v290_v3, 0 }
  0x27   :  { %vm371_vm3 = vmand %vm136_vm4, %vm137_vm8  ;;  %v96_v32 = vsel %vm530_vm15, 2139095040, %v254_v31  ;;  %vm140_vm15 = vcmp.lt.f32.partialorder %v288_v2, 0  ;;  %v110_v39 = vsel %vm365_vm5, %v109_v28, %v108_v26 }
  0x28   :  { %vm380_vm10 = vmand %vm128_vm7, %vm513_vm0  ;;  %vm541_vm0 = vcmp.lt.f32.partialorder %v282_v0, 0 }
  0x29   :  { %v178_v12 = vpop.eup %177  ;;  %vm388_vm1 = vmxor %vm128_vm7, %vm144_vm9  ;;  %vm105_vm9 = vcmp.eq.f32.partialorder %v282_v0, 3212836864  ;;  %v111_v47 = vsel %vm541_vm0, %v110_v39, %v108_v26  ;;  %vm157_vm7 = vcmp.eq.f32.partialorder %v288_v2, 3212836864 }
  0x2a   :  { %v70_v14 = vmul.f32 %v178_v12, %v290_v3  ;;  %v180_v19 = vpop.eup %179  ;;  %vm396_vm4 = vmand %vm91_vm11, %vm365_vm5  ;;  %vm143_vm5 = vcmp.lt.s32.totalorder %v288_v2, 0 }
  0x2b   :  { %v122_v21 = vmul.f32 %v180_v19, %v299_v6  ;;  %vm535_vm8 = vmor %vm324_vm6, %vm350_vm14  ;;  %vm538_vm6 = vcmp.eq.f32.partialorder %v282_v0, 0  ;;  %vm113_vm14 = vcmp.ne.f32.partialorder %v282_v0, %v282_v0 }
  0x2c   :  { %181 = vpow2.f32 %v70_v14  ;;  %v104_v37 = vsel %vm535_vm8, 2139095040, %v254_v31  ;;  %vm416_vm11 = vmand %vm132_vm2, %vm371_vm3  ;;  %vm74_vm2 = vcmp.eq.f32.partialorder %v290_v3, 0  ;;  %vm90_vm3 = vcmp.eq.f32.partialorder %v282_v0, 1065353216 }
  0x2d   :  { %183 = vpow2.f32 %v122_v21  ;;  %v106_v45 = vsel %vm105_vm9, 1065353216, %v104_v37  ;;  %vm436_vm8 = vmand %vm140_vm15, %vm344_vm13  ;;  %v162_v55 = vsel %vm416_vm11, %v161_v43, %v160_v34 }
  0x2e   :  { %vm544_vm0 = vmor %vm380_vm10, %vm388_vm1  ;;  %vm546_vm10 = vcmp.eq.f32.partialorder %v288_v2, 0  ;;  %v163_v62 = vsel %vm140_vm15, %v162_v55, %v160_v34 }
  0x2f   :  { %v156_v52 = vsel %vm544_vm0, 2139095040, %v254_v31  ;;  %vm117_vm9 = vmor %vm90_vm3, %vm74_vm2  ;;  %vm166_vm2 = vcmp.ne.f32.partialorder %v299_v6, %v299_v6  ;;  %vm142_vm3 = vcmp.eq.f32.partialorder %v288_v2, 1065353216 }
  0x30   :  { %vm150_vm1 = vmand %vm143_vm5, %vm416_vm11  ;;  %v158_v60 = vsel %vm157_vm7, 1065353216, %v156_v52  ;;  %vm547_vm11 = vcmp.eq.f32.partialorder %v290_v3, 1065353216 }
  0x39   :  { %v182_v35 = vpop.eup %181 }
  0x3a   :  { %v95_v38 = vsel %vm337_vm12, 2143289344, %v182_v35  ;;  %vm114_vm12 = vcmp.ne.f32.partialorder %v290_v3, %v290_v3  ;;  %v184_v49 = vpop.eup %183 }
  0x3b   :  { %v97_v42 = vsel %vm538_vm6, %v96_v32, %v95_v38  ;;  %vm93_vm6 = vcmp.eq.f32.partialorder %v285_v1, 2139095040  ;;  %vm455_vm13 = vmor %vm113_vm14, %vm114_vm12  ;;  %vm126_vm14 = vcmp.eq.f32.partialorder %v299_v6, 0  ;;  %v147_v54 = vsel %vm436_vm8, 2143289344, %v184_v49 }
  0x3c   :  { %v99_v44 = vxor.u32 2147483648, %v97_v42  ;;  %v149_v57 = vsel %vm546_vm10, %v148_v48, %v147_v54  ;;  %vm165_vm12 = vcmp.ne.f32.partialorder %v288_v2, %v288_v2  ;;  %vm145_vm8 = vcmp.eq.f32.partialorder %v296_v5, 2139095040 }
  0x3d   :  { %v151_v59 = vxor.u32 2147483648, %v149_v57  ;;  %vm167_vm5 = vmor %vm165_vm12, %vm166_vm2 }
  0x3e   :  { %v100_v50 = vsel %vm396_vm4, %v99_v44, %v97_v42  ;;  %vm545_vm4 = vcmp.eq.f32.partialorder %v293_v4, 2139095040 }
  0x3f   :  { %v107_v53 = vsel %vm545_vm4, %v106_v45, %v100_v50  ;;  %v152_v1 = vsel %vm150_vm1, %v151_v59, %v149_v57 }
  0x40   :  { %v112_v56 = vsel %vm93_vm6, %v111_v47, %v107_v53  ;;  %vm548_vm6 = vcmp.eq.f32.partialorder %v303_v8, 2139095040 }
  0x41   :  { %v116_v58 = vsel %vm455_vm13, 2143289344, %v112_v56  ;;  %v159_v7 = vsel %vm548_vm6, %v158_v60, %v152_v1  ;;  %vm169_vm13 = vmor %vm142_vm3, %vm126_vm14 }
  0x42   :  { %v118_v61 = vsel %vm117_vm9, 1065353216, %v116_v58  ;;  %vm127_vm9 = vcmp.eq.f32.partialorder %v299_v6, 1065353216  ;;  %v164_v9 = vsel %vm145_vm8, %v163_v62, %v159_v7 }
  0x43   :  { %v119_v63 = vsel %vm547_vm11, %v282_v0, %v118_v61  ;;  %v168_v5 = vsel %vm167_vm5, 2143289344, %v164_v9 }
  0x44   :  { %v48_v4 = vmul.f32 %v119_v63, %v47_v40  ;;  %v170_v10 = vsel %vm169_vm13, 1065353216, %v168_v5 }
  0x45   :  { %v171_v3 = vsel %vm127_vm9, %v288_v2, %v170_v10 }
  0x46   :  { %50 = vst [vmem:[#allocation8] sm:$0xff] %v48_v4  ;;  %v49_v0 = vmul.f32 %v171_v3, %v47_v40 }
  0x48   :  { %51 = vst [vmem:[#allocation8 + $0x8] sm:$0xff] %v49_v0 }
  0x49   :  { %236 = shalt.err (!%p233_p0)
}
  0x4a   :  { %61 = dma.vmem_to_hbm [thread:$0]  %s59_s22, 256, %s507_s3, [#allocation5]  }
  0x4b   :  { %249 = dma.done.wait [#allocation5], 256  }
  0x4c   :  { %250 = vsyncadd [#allocation5], 4294967040 }
  0x4d   :  { %65 = vsyncpa [#allocation4], 1 }
  0x4e   :  { %66 = vsyncpa [#allocation7], 1 }
  0x4f   :  { %67 = vsyncpa [#allocation5], 1 }

</bundles_post_ra>
